<compile_context>
chip_gen: v6e
topology: v6e:2x2x1
jax: 0.10.0
libtpu: 0.0.40
codegen_flags: <defaults>
</compile_context>

<pallas_src>
import jax
import jax.numpy as jnp
from jax import lax
from jax.experimental import pallas as pl
from jax.experimental.pallas import tpu as pltpu


def _fused_kernel(w_ref, b_ref, x1_ref, x2_ref, out_ref):
    # w_ref : SMEM (C*Cin,)   flattened 1x1 conv weights (c-major, ci-minor)
    # b_ref : SMEM (C,)       conv bias
    # x1_ref: VMEM (Cin, H, W)   un-padded input (batch squeezed)
    # x2_ref: VMEM (Wp, Hp)      un-transposed x2 (batch squeezed)
    # out_ref: VMEM (C, Hp, Wp)  full output, one store
    Cin, H, W = x1_ref.shape
    C, Hp, Wp = out_ref.shape

    x1 = x1_ref[...].astype(jnp.float32)
    x2 = x2_ref[...].astype(jnp.float32)

    # ---- x2.transpose(1,2) fused in-kernel: x2^T = I @ x2^T via rhs-contracted
    #      dot_general (same MXU pattern as attention q @ k^T). ----
    ii = lax.broadcasted_iota(jnp.int32, (Hp, Hp), 0)
    jj = lax.broadcasted_iota(jnp.int32, (Hp, Hp), 1)
    eye = (ii == jj).astype(jnp.float32)
    x2t = lax.dot_general(eye, x2, (((1,), (1,)), ((), ())),
                          preferred_element_type=jnp.float32)      # (Hp, Wp)

    # ---- zero padding (conv padding=1) fused via shift-selection matmuls ----
    pr_i = lax.broadcasted_iota(jnp.int32, (Hp, H), 0)
    pr_k = lax.broadcasted_iota(jnp.int32, (Hp, H), 1)
    p_row = (pr_i == pr_k + 1).astype(jnp.float32)                 # (Hp, H)
    pc_k = lax.broadcasted_iota(jnp.int32, (W, Wp), 0)
    pc_j = lax.broadcasted_iota(jnp.int32, (W, Wp), 1)
    p_colT = (pc_j == pc_k + 1).astype(jnp.float32)                # (W, Wp)

    # ---- 1x1 conv + bias; zero-pad border of conv(x) is exactly the bias ----
    chans = []
    for c in range(C):                      # static unroll, C is tiny
        acc = jnp.zeros((H, W), jnp.float32)
        for ci in range(Cin):               # static unroll, Cin is tiny
            acc = acc + w_ref[c * Cin + ci] * x1[ci]
        inner = jnp.dot(p_row,
                        jnp.dot(acc, p_colT, preferred_element_type=jnp.float32),
                        preferred_element_type=jnp.float32)        # (Hp, Wp), zero border
        chans.append(inner + b_ref[c])
    v1 = jnp.stack(chans, axis=0)           # (C, Hp, Wp)

    # ---- v3 = v1 * x2^T ; softmax over rows (PyTorch dim=2), batched over C ----
    v3 = v1 * x2t[None, :, :]
    m = jnp.max(v3, axis=1, keepdims=True)
    e = jnp.exp(v3 - m)
    s = jnp.sum(e, axis=1, keepdims=True)
    inv = pl.reciprocal(s, approx=True)     # EUP slot
    inv = inv * (2.0 - s * inv)             # one Newton step -> f32-accurate
    v4 = e * inv

    # ---- dropout(p=0) is identity; batched matmul softmax(v3) @ v1 on the MXU ----
    v6 = jnp.einsum('cij,cjk->cik', v4, v1, preferred_element_type=jnp.float32)
    out_ref[...] = v6.astype(out_ref.dtype)


def model_forward(x1, x2, w, b):
    """x1: (1, Cin, H, W) NCHW; x2: (1, W+2, H+2); w: (C, Cin, 1, 1); b: (C,)."""
    B, Cin, H, W = x1.shape
    C = w.shape[0]
    assert B == 1, "broadcasting of x2 in the reference module requires B == 1"
    Hp, Wp = H + 2, W + 2
    assert Hp == Wp, "v5.matmul(v1) requires square padded spatial dims"
    assert x2.shape == (B, Wp, Hp)

    # Glue is metadata-only (reshapes); pad & transpose happen inside the kernel.
    x1s = x1.reshape(Cin, H, W)      # squeeze batch
    x2s = x2.reshape(Wp, Hp)         # squeeze batch
    wf = w.reshape(C * Cin)          # flatten 1x1 kernel weights (1-D SMEM)

    out = pl.pallas_call(
        _fused_kernel,
        out_shape=jax.ShapeDtypeStruct((C, Hp, Wp), x1.dtype),
        grid=(1,),                                              # single invocation
        in_specs=[
            pl.BlockSpec(memory_space=pltpu.MemorySpace.SMEM),  # weights (1-D scalars)
            pl.BlockSpec(memory_space=pltpu.MemorySpace.SMEM),  # bias    (1-D scalars)
            pl.BlockSpec((Cin, H, W), lambda i: (0, 0, 0)),     # full x1
            pl.BlockSpec((Wp, Hp), lambda i: (0, 0)),           # full x2
        ],
        out_specs=pl.BlockSpec((C, Hp, Wp), lambda i: (0, 0, 0)),
        compiler_params=pltpu.CompilerParams(
            dimension_semantics=("arbitrary",)),
    )(wf, b, x1s, x2s)

    return out[None]  # (1, C, Hp, Wp)


def ref_forward(x1, x2, w, b):
    """Pure-JAX reference mirroring the PyTorch forward."""
    xpad = jnp.pad(x1, ((0, 0), (0, 0), (1, 1), (1, 1)))
    v1 = jnp.einsum('bihw,oi->bohw', xpad, w[:, :, 0, 0]) + b[None, :, None, None]
    v2 = jnp.swapaxes(x2, 1, 2)
    v3 = v1 * v2[:, None, :, :]           # valid because B == 1
    v4 = jax.nn.softmax(v3, axis=2)
    v6 = jnp.einsum('bcij,bcjk->bcik', v4, v1)
    return v6


if __name__ == "__main__":
    key = jax.random.PRNGKey(0)
    k1, k2, k3, k4 = jax.random.split(key, 4)

    in_channels, out_channels, heads = 1, 1, 2
    C = heads * out_channels
    B, H, W = 1, 14, 14                   # padded spatial becomes 16x16

    x1 = jax.random.normal(k1, (B, in_channels, H, W), jnp.float32)
    x2 = jax.random.normal(k2, (B, W + 2, H + 2), jnp.float32)
    w = 0.5 * jax.random.normal(k3, (C, in_channels, 1, 1), jnp.float32)
    b = 0.1 * jax.random.normal(k4, (C,), jnp.float32)

    out = jax.jit(model_forward)(x1, x2, w, b)
    out = jax.block_until_ready(out)

    ref = ref_forward(x1, x2, w, b)
    assert out.shape == (B, C, H + 2, W + 2), out.shape
    assert bool(jnp.allclose(out, ref, atol=1e-4, rtol=1e-4)), "mismatch vs reference"
    print("KERNEL_OK")
</pallas_src>

<mosaic_0001>
module attributes {stable_mosaic.version = 11 : i64} {
  func.func @_fused_kernel(%arg0: i32, %arg1: memref<2xf32, #tpu.memory_space<smem>>, %arg2: memref<2xf32, #tpu.memory_space<smem>>, %arg3: memref<1x14x14xf32, #tpu.memory_space<vmem>>, %arg4: memref<16x16xf32, #tpu.memory_space<vmem>>, %arg5: memref<2x16x16xf32, #tpu.memory_space<vmem>>) attributes {dimension_semantics = [#tpu.dimension_semantics<arbitrary>], iteration_bounds = array<i64: 1>, scalar_prefetch = 0 : i64, scratch_operands = 0 : i64, tpu.core_type = #tpu.core_type<tc>, window_params = [{transform_indices = @transform_0, window_bounds = array<i64: 2>}, {transform_indices = @transform_1, window_bounds = array<i64: 2>}, {pipeline_mode = #tpu.pipeline_mode<synchronous>, transform_indices = @transform_2, window_bounds = array<i64: 1, 14, 14>}, {pipeline_mode = #tpu.pipeline_mode<synchronous>, transform_indices = @transform_3, window_bounds = array<i64: 16, 16>}, {pipeline_mode = #tpu.pipeline_mode<synchronous>, transform_indices = @transform_4, window_bounds = array<i64: 2, 16, 16>}]} {
    %c0 = arith.constant 0 : index
    %c0_0 = arith.constant 0 : index
    %c0_1 = arith.constant 0 : index
    %0 = vector.load %arg3[%c0, %c0_0, %c0_1] : memref<1x14x14xf32, #tpu.memory_space<vmem>>, vector<1x14x14xf32>
    %c0_2 = arith.constant 0 : index
    %c0_3 = arith.constant 0 : index
    %1 = vector.load %arg4[%c0_2, %c0_3] : memref<16x16xf32, #tpu.memory_space<vmem>>, vector<16x16xf32>
    %2 = tpu.iota {dimensions = array<i32: 0>} : vector<16x16xi32>
    %3 = tpu.iota {dimensions = array<i32: 1>} : vector<16x16xi32>
    %4 = arith.cmpi eq, %2, %3 : vector<16x16xi32>
    %5 = arith.extui %4 : vector<16x16xi1> to vector<16x16xi32>
    %6 = arith.sitofp %5 : vector<16x16xi32> to vector<16x16xf32>
    %cst = arith.constant dense<0.000000e+00> : vector<16x16xf32>
    %7 = tpu.matmul %6, %1, %cst {dimension_numbers = #tpu.dot_dimension_numbers<[1], [1], [0], [0], [0, 0, 1, 0], [], []>} : vector<16x16xf32>, vector<16x16xf32>, vector<16x16xf32> -> vector<16x16xf32>
    %8 = tpu.iota {dimensions = array<i32: 0>} : vector<16x14xi32>
    %9 = tpu.iota {dimensions = array<i32: 1>} : vector<16x14xi32>
    %c1_i32 = arith.constant 1 : i32
    %10 = vector.broadcast %c1_i32 : i32 to vector<16x14xi32>
    %11 = arith.addi %9, %10 : vector<16x14xi32>
    %12 = arith.cmpi eq, %8, %11 : vector<16x14xi32>
    %13 = arith.extui %12 : vector<16x14xi1> to vector<16x14xi32>
    %14 = arith.sitofp %13 : vector<16x14xi32> to vector<16x14xf32>
    %15 = tpu.iota {dimensions = array<i32: 0>} : vector<14x16xi32>
    %16 = tpu.iota {dimensions = array<i32: 1>} : vector<14x16xi32>
    %c1_i32_4 = arith.constant 1 : i32
    %17 = vector.broadcast %c1_i32_4 : i32 to vector<14x16xi32>
    %18 = arith.addi %15, %17 : vector<14x16xi32>
    %19 = arith.cmpi eq, %16, %18 : vector<14x16xi32>
    %20 = arith.extui %19 : vector<14x16xi1> to vector<14x16xi32>
    %21 = arith.sitofp %20 : vector<14x16xi32> to vector<14x16xf32>
    %cst_5 = arith.constant 0.000000e+00 : f32
    %22 = vector.broadcast %cst_5 : f32 to vector<14x14xf32>
    %c0_6 = arith.constant 0 : index
    %23 = memref.load %arg1[%c0_6] : memref<2xf32, #tpu.memory_space<smem>>
    %24 = vector.shape_cast %0 : vector<1x14x14xf32> to vector<14x14xf32>
    %25 = vector.broadcast %23 : f32 to vector<14x14xf32>
    %26 = arith.mulf %25, %24 : vector<14x14xf32>
    %27 = arith.addf %22, %26 : vector<14x14xf32>
    %cst_7 = arith.constant dense<0.000000e+00> : vector<14x16xf32>
    %28 = tpu.matmul %27, %21, %cst_7 {dimension_numbers = #tpu.dot_dimension_numbers<[1], [0], [0], [1], [0, 0, 1, 1], [], []>} : vector<14x14xf32>, vector<14x16xf32>, vector<14x16xf32> -> vector<14x16xf32>
    %cst_8 = arith.constant dense<0.000000e+00> : vector<16x16xf32>
    %29 = tpu.matmul %14, %28, %cst_8 {dimension_numbers = #tpu.dot_dimension_numbers<[1], [0], [0], [1], [0, 0, 1, 1], [], []>} : vector<16x14xf32>, vector<14x16xf32>, vector<16x16xf32> -> vector<16x16xf32>
    %c0_9 = arith.constant 0 : index
    %30 = memref.load %arg2[%c0_9] : memref<2xf32, #tpu.memory_space<smem>>
    %31 = vector.broadcast %30 : f32 to vector<16x16xf32>
    %32 = arith.addf %29, %31 : vector<16x16xf32>
    %cst_10 = arith.constant 0.000000e+00 : f32
    %33 = vector.broadcast %cst_10 : f32 to vector<14x14xf32>
    %c1 = arith.constant 1 : index
    %34 = memref.load %arg1[%c1] : memref<2xf32, #tpu.memory_space<smem>>
    %35 = vector.shape_cast %0 : vector<1x14x14xf32> to vector<14x14xf32>
    %36 = vector.broadcast %34 : f32 to vector<14x14xf32>
    %37 = arith.mulf %36, %35 : vector<14x14xf32>
    %38 = arith.addf %33, %37 : vector<14x14xf32>
    %cst_11 = arith.constant dense<0.000000e+00> : vector<14x16xf32>
    %39 = tpu.matmul %38, %21, %cst_11 {dimension_numbers = #tpu.dot_dimension_numbers<[1], [0], [0], [1], [0, 0, 1, 1], [], []>} : vector<14x14xf32>, vector<14x16xf32>, vector<14x16xf32> -> vector<14x16xf32>
    %cst_12 = arith.constant dense<0.000000e+00> : vector<16x16xf32>
    %40 = tpu.matmul %14, %39, %cst_12 {dimension_numbers = #tpu.dot_dimension_numbers<[1], [0], [0], [1], [0, 0, 1, 1], [], []>} : vector<16x14xf32>, vector<14x16xf32>, vector<16x16xf32> -> vector<16x16xf32>
    %c1_13 = arith.constant 1 : index
    %41 = memref.load %arg2[%c1_13] : memref<2xf32, #tpu.memory_space<smem>>
    %42 = vector.broadcast %41 : f32 to vector<16x16xf32>
    %43 = arith.addf %40, %42 : vector<16x16xf32>
    %44 = vector.shape_cast %32 : vector<16x16xf32> to vector<1x16x16xf32>
    %45 = vector.shape_cast %43 : vector<16x16xf32> to vector<1x16x16xf32>
    %46 = tpu.concatenate %44, %45 in 0 : vector<1x16x16xf32>, vector<1x16x16xf32> -> vector<2x16x16xf32>
    %47 = vector.shape_cast %7 : vector<16x16xf32> to vector<1x16x16xf32>
    %48 = vector.broadcast %47 : vector<1x16x16xf32> to vector<2x16x16xf32>
    %49 = arith.mulf %46, %48 : vector<2x16x16xf32>
    %cst_14 = arith.constant dense<0xFF800000> : vector<2x16xf32>
    %50 = vector.multi_reduction <maximumf>, %49, %cst_14 [1] : vector<2x16x16xf32> to vector<2x16xf32>
    %51 = vector.shape_cast %50 : vector<2x16xf32> to vector<2x1x16xf32>
    %52 = vector.broadcast %51 : vector<2x1x16xf32> to vector<2x16x16xf32>
    %53 = arith.subf %49, %52 : vector<2x16x16xf32>
    %54 = math.exp %53 : vector<2x16x16xf32>
    %cst_15 = arith.constant dense<0.000000e+00> : vector<2x16xf32>
    %55 = vector.multi_reduction <add>, %54, %cst_15 [1] : vector<2x16x16xf32> to vector<2x16xf32>
    %56 = vector.shape_cast %55 : vector<2x16xf32> to vector<2x1x16xf32>
    %57 = tpu.reciprocal %56 {approx = true} : vector<2x1x16xf32> -> vector<2x1x16xf32>
    %58 = arith.mulf %56, %57 : vector<2x1x16xf32>
    %cst_16 = arith.constant 2.000000e+00 : f32
    %59 = vector.broadcast %cst_16 : f32 to vector<2x1x16xf32>
    %60 = arith.subf %59, %58 : vector<2x1x16xf32>
    %61 = arith.mulf %57, %60 : vector<2x1x16xf32>
    %62 = vector.broadcast %61 : vector<2x1x16xf32> to vector<2x16x16xf32>
    %63 = arith.mulf %54, %62 : vector<2x16x16xf32>
    "tpu.trace_start"() <{level = 10 : i32, message = "cij,cjk->cik"}> : () -> ()
    %cst_17 = arith.constant dense<0.000000e+00> : vector<2x16x16xf32>
    %64 = tpu.matmul %63, %46, %cst_17 {dimension_numbers = #tpu.dot_dimension_numbers<[2], [1], [1], [2], [0, 0, 0, 1, 1, 2], [0], [0]>} : vector<2x16x16xf32>, vector<2x16x16xf32>, vector<2x16x16xf32> -> vector<2x16x16xf32>
    "tpu.trace_stop"() : () -> ()
    %c0_18 = arith.constant 0 : index
    %c0_19 = arith.constant 0 : index
    %c0_20 = arith.constant 0 : index
    %65 = vector.load %arg5[%c0_18, %c0_19, %c0_20] : memref<2x16x16xf32, #tpu.memory_space<vmem>>, vector<2x16x16xf32>
    tpu.vector_store %arg5[%c0_18, %c0_19, %c0_20], %64 {strides = array<i32>} : memref<2x16x16xf32, #tpu.memory_space<vmem>>, vector<2x16x16xf32>,
    return
  }
  func.func @transform_0(%arg0: i32) -> i32 {
    %c0_i32 = arith.constant 0 : i32
    %c0_i32_0 = arith.constant 0 : i32
    return %c0_i32 : i32
  }
  func.func @transform_1(%arg0: i32) -> i32 {
    %c0_i32 = arith.constant 0 : i32
    %c0_i32_0 = arith.constant 0 : i32
    return %c0_i32 : i32
  }
  func.func @transform_2(%arg0: i32) -> (i32, i32, i32) {
    %c0_i32 = arith.constant 0 : i32
    %c0_i32_0 = arith.constant 0 : i32
    %c0_i32_1 = arith.constant 0 : i32
    %c0_i32_2 = arith.constant 0 : i32
    return %c0_i32, %c0_i32_0, %c0_i32_1 : i32, i32, i32
  }
  func.func @transform_3(%arg0: i32) -> (i32, i32) {
    %c0_i32 = arith.constant 0 : i32
    %c0_i32_0 = arith.constant 0 : i32
    %c0_i32_1 = arith.constant 0 : i32
    return %c0_i32, %c0_i32_0 : i32, i32
  }
  func.func @transform_4(%arg0: i32) -> (i32, i32, i32) {
    %c0_i32 = arith.constant 0 : i32
    %c0_i32_0 = arith.constant 0 : i32
    %c0_i32_1 = arith.constant 0 : i32
    %c0_i32_2 = arith.constant 0 : i32
    return %c0_i32, %c0_i32_0, %c0_i32_1 : i32, i32, i32
  }
}

</mosaic_0001>

<bundles_post_ra>
// kernel: model_forward.1
= control target key start
LH: loop header
LB: loop body
LE: loop exit
PB: predicated region body
PF: predicated region fallthrough
CT: control target
= control target key end

     0   :  { %9 = vsyncpa [#allocation4], 0  ;;  %s1024_s0 = inlined_call_operand.vmem [shape: f32[2], index: 0, kind: input, shape index: {}]   ;;  %s1025_s1 = inlined_call_operand.vmem [shape: f32[2], index: 1, kind: input, shape index: {}]   ;;  %s1026_s2 = inlined_call_operand.vmem [shape: f32[1,14,14], index: 2, kind: input, shape index: {}]   ;;  %s1027_s3 = inlined_call_operand.vmem [shape: f32[16,16], index: 3, kind: input, shape index: {}]   ;;  %s1028_s4 = inlined_call_operand.hbm [shape: f32[2,16,16], index: 4, kind: output, shape index: {}]  }
   0x1   :  { %10 = vsyncpa [#allocation6], 0 }
   0x2   :  { %11 = vsyncpa [#allocation3], 0  ;;  %s18_s17 = sshll.u32 %s1024_s0, 4  ;;  %s28_s20 = sshll.u32 %s1025_s1, 4  ;;  %s19_s17 = int_to_ptr.vmem [resolvable:$true] %s18_s17  ;;  %s29_s20 = int_to_ptr.vmem [resolvable:$true] %s28_s20 }
   0x3   :  { %s880_s21 = scalar_lea.vmem %s19_s17, 16  ;;  %p885_p1 = scmp.lt.s32.totalorder %s19_s17, %s19_s17 }
   0x4   :  { %p881_p0 = scmp.ne.s32.totalorder %s19_s17, %s880_s21  ;;  %p886_p2 = scmp.lt.s32.totalorder %s880_s21, %s880_s21 }
   0x6   :  { %p887_p3 = por %p886_p2, %p885_p1 }
   0x8   :  { %p888_p4 = pnand %p887_p3, %p881_p0 }
   0xa   :  { %891 = shalt.err (!%p888_p4)
}
   0xb   :  { %s930_s22 = smov [#allocation2]   ;;  %s892_s23 = scalar_lea.vmem %s29_s20, 16 }
   0xc   :  { %21 = dma.vmem_to_smem %s19_s17, 16, %s930_s22, [#allocation4]  }
   0xd   :  { %p893_p5 = scmp.ne.s32.totalorder %s29_s20, %s892_s23  ;;  %p897_p6 = scmp.lt.s32.totalorder %s29_s20, %s29_s20 }
   0xe   :  { %p898_p7 = scmp.lt.s32.totalorder %s892_s23, %s892_s23 }
  0x10   :  { %p899_p8 = por %p898_p7, %p897_p6 }
  0x12   :  { %p900_p9 = pnand %p899_p8, %p893_p5 }
  0x14   :  { %903 = shalt.err (!%p900_p9)
}
  0x15   :  { %s931_s0 = smov [#allocation5]  }
  0x16   :  { %31 = dma.vmem_to_smem %s29_s20, 16, %s931_s0, [#allocation6]  }
  0x17   :  { %924 = dma.done.wait [#allocation4], 16  }
  0x18   :  { %925 = vsyncadd [#allocation4], 4294967280 }
  0x19   :  { %926 = dma.done.wait [#allocation6], 16  }
  0x1a   :  { %927 = vsyncadd [#allocation6], 4294967280 }
  0x1b   :  { %42 = sfence }
  0x1c   :  { %v46_v0 = vld [vmem:[%s1027_s3 + $0x8] sm:$0xff]  ;;  %vm58_vm0 = vcmask 130048   ;;  %v45_v1 = vld [vmem:[%s1027_s3] sm:$0xff]  ;;  %v47_v2 = vlaneseq  ;;  %s161_s27 = sld [smem:[#allocation2]]  ;;  %v932_v6 = vmov 0.0   ;;  %vm174_vm3 = vcmask 1045504  }
  0x1d   :  { %812 = vmatprep.subr.msk.mxu0 %vm58_vm0, %v46_v0  ;;  %s976_s28 = sld [smem:[#allocation2 + $0x1]]  ;;  %v43_v9 = vld [vmem:[%s1026_s2] sm:$0xff]  ;;  %v44_v12 = vld [vmem:[%s1026_s2 + $0x8] sm:$0x3f]  ;;  %vm167_vm5 = vcmask 113664   ;;  %v933_v19 = vmov 1.0  }
  0x1e   :  { %813 = vmatpush3.xpose.msk.msra.mxu0 %vm58_vm0, %v46_v0  ;;  %v48_v3 = vshrl.u32 %v47_v2, 7  ;;  %v51_v4 = vand.u32 127, %v47_v2  ;;  %s253_s2 = sld [smem:[#allocation5]]  ;;  %s934_s7 = smov [#allocation7]  }
  0x1f   :  { %814 = vmatprep.subr.msk.mxu0 %vm58_vm0, %v45_v1  ;;  %s776_s6 = sld [smem:[#allocation5 + $0x1]]  ;;  %s741_s8 = sshll.u32 %s934_s7, 4  ;;  %s742_s8 = int_to_ptr.vmem [resolvable:$true] %s741_s8 }
  0x20   :  { %v49_v5 = vadd.s32 8, %v48_v3  ;;  %vm52_vm1 = vcmp.eq.s32.totalorder %v48_v3, %v51_v4  ;;  %v153_v8 = vadd.s32 1, %v48_v3  ;;  %v146_v21 = vadd.s32 1, %v51_v4  ;;  %s904_s9 = scalar_lea.vmem %s742_s8, 512  ;;  %p909_p11 = scmp.lt.s32.totalorder %s742_s8, %s742_s8 }
  0x21   :  { %v754_v7 = vsel %vm52_vm1, 1.0, %v932_v6  ;;  %p905_p10 = scmp.ne.s32.totalorder %s742_s8, %s904_s9  ;;  %p910_p12 = scmp.lt.s32.totalorder %s904_s9, %s904_s9 }
  0x22   :  { %815 = vmatpush3.xpose.msk.msra.mxu0 %vm58_vm0, %v45_v1  ;;  %v154_v10 = vadd.s32 1, %v49_v5  ;;  %816 = vmatprep.mubr.msk.f32.mxu0 %vm58_vm0, %v754_v7  ;;  %vm53_vm2 = vcmp.eq.s32.totalorder %v49_v5, %v51_v4  ;;  %v162_v13 = vstv %s161_s27  ;;  %vm155_vm6 = vcmp.eq.s32.totalorder %v51_v4, %v153_v8 }
  0x23   :  { %v755_v11 = vsel %vm53_vm2, 1.0, %v932_v6  ;;  %v163_v14 = vmul.f32 %v162_v13, %v43_v9  ;;  %v340_v15 = vstv %s976_s28  ;;  %v164_v17 = vmul.f32 %v162_v13, %v44_v12  ;;  %p911_p13 = por %p910_p12, %p909_p11 }
  0x24   :  { %vm156_vm4 = vcmp.eq.s32.totalorder %v51_v4, %v154_v10  ;;  %v341_v18 = vmul.f32 %v340_v15, %v43_v9  ;;  %v342_v20 = vmul.f32 %v340_v15, %v44_v12  ;;  %vm147_vm7 = vcmp.eq.s32.totalorder %v48_v3, %v146_v21 }
  0x25   :  { %v763_v16 = vsel %vm156_vm4, 1.0, %v932_v6  ;;  %817 = vmatmul.mubr.msk.f32.vlgmr.msra.gmra.mxu0 %vm58_vm0, %v755_v11  ;;  %823 = vmatprep.mubr.msk.f32.mxu1 %vm167_vm5, %v163_v14  ;;  %v760_v22 = vsel %vm147_vm7, 1.0, %v932_v6  ;;  %vm148_vm8 = vcmp.eq.s32.totalorder %v49_v5, %v146_v21  ;;  %v254_v30 = vstv %s253_s2  ;;  %p912_p0 = pnand %p911_p13, %p905_p10 }
  0x26   :  { %819 = vmatprep.subr.msk.mxu1 %vm174_vm3, %v763_v16  ;;  %833 = vmatprep.subr.msk.mxu0 %vm174_vm3, %v763_v16  ;;  %v761_v28 = vsel %vm148_vm8, 1.0, %v932_v6  ;;  %v427_v34 = vstv %s776_s6 }
  0x27   :  { %820 = vmatpush3.msk.msra.mxu1 %vm174_vm3, %v763_v16  ;;  %834 = vmatpush3.msk.msra.mxu0 %vm174_vm3, %v763_v16 }
  0x28   :  { %821 = vmatprep.subr.msk.mxu1 %vm155_vm6, %v933_v19  ;;  %835 = vmatprep.subr.msk.mxu0 %vm155_vm6, %v933_v19 }
  0x29   :  { %822 = vmatpush3.msk.msra.mxu1 %vm155_vm6, %v933_v19  ;;  %836 = vmatpush3.msk.msra.mxu0 %vm155_vm6, %v933_v19 }
  0x2a   :  { %824 = vmatmul.mubr.msk.f32.vlgmr.msra.gmra.mxu1 %vm167_vm5, %v164_v17  ;;  %837 = vmatprep.mubr.msk.f32.mxu0 %vm167_vm5, %v341_v18 }
  0x2b   :  { %838 = vmatmul.mubr.msk.f32.vlgmr.msra.gmra.mxu0 %vm167_vm5, %v342_v20  ;;  %830 = vmatprep.mubr.msk.f32.mxu1 %vm167_vm5, %v760_v22 }
  0xe5   :  { %v818_v23 = vpop.f32.mrf.mxu0 }
  0xe7   :  { %v137_v24 = vpop.f32.mrf.mxu0 }
  0xea   :  { %v825_v25 = vpop.f32.mrf.mxu1 }
  0xeb   :  { %826 = vmatprep.subr.msk.mxu1 %vm174_vm3, %v825_v25  ;;  %v839_v27 = vpop.f32.mrf.mxu0 }
  0xec   :  { %v244_v26 = vpop.f32.mrf.mxu1  ;;  %827 = vmatpush3.msk.msra.mxu1 %vm174_vm3, %v825_v25 }
  0xed   :  { %828 = vmatprep.subr.mxu1 %v244_v26  ;;  %v417_v29 = vpop.f32.mrf.mxu0 }
  0xee   :  { %829 = vmatpush3.msra.mxu1 %v244_v26 }
  0xef   :  { %831 = vmatmul.mubr.msk.f32.vlgmr.msra.gmra.mxu1 %vm167_vm5, %v761_v28  ;;  %840 = vmatprep.subr.msk.mxu1 %vm174_vm3, %v839_v27 }
  0xf0   :  { %841 = vmatpush3.msk.msra.mxu1 %vm174_vm3, %v839_v27  ;;  %844 = vmatprep.mubr.msk.f32.mxu1 %vm167_vm5, %v760_v22 }
  0xf1   :  { %842 = vmatprep.subr.mxu1 %v417_v29 }
  0xf2   :  { %843 = vmatpush3.msra.mxu1 %v417_v29 }
  0xf3   :  { %845 = vmatmul.mubr.msk.f32.vlgmr.msra.gmra.mxu1 %vm167_vm5, %v761_v28 }
 0x1af   :  { %v832_v31 = vpop.f32.mrf.mxu1 }
 0x1b0   :  { %v336_v32 = vadd.f32 %v832_v31, %v254_v30 }
 0x1b1   :  { %v330_v33 = vpop.f32.mrf.mxu1 }
 0x1b2   :  { %v507_v35 = vmul.f32 %v818_v23, %v336_v32  ;;  %v331_v36 = vadd.f32 %v330_v33, %v254_v30  ;;  %847 = vmatprep.subr.mxu0 %v336_v32 }
 0x1b3   :  { %v846_v37 = vpop.f32.mrf.mxu1  ;;  %848 = vmatpush3.msra.mxu0 %v336_v32 }
 0x1b4   :  { %v506_v38 = vmul.f32 %v331_v36, %v137_v24  ;;  %v503_v39 = vadd.f32 %v846_v37, %v427_v34  ;;  %849 = vmatprep.subr.mxu0 %v331_v36  ;;  %v511_v41 = vsel %vm58_vm0, %v507_v35, -inf }
 0x1b5   :  { %v497_v40 = vpop.f32.mrf.mxu1  ;;  %850 = vmatpush3.msra.mxu0 %v331_v36 }
 0x1b6   :  { %v510_v42 = vsel %vm58_vm0, %v506_v38, -inf  ;;  %v509_v43 = vmul.f32 %v818_v23, %v503_v39  ;;  %v498_v44 = vadd.f32 %v497_v40, %v427_v34  ;;  %854 = vmatprep.subr.mxu1 %v503_v39 }
 0x1b7   :  { %v512_v45 = vmax.f32 %v510_v42, %v511_v41  ;;  %855 = vmatpush3.msra.mxu1 %v503_v39 }
 0x1b8   :  { %v508_v46 = vmul.f32 %v498_v44, %v137_v24  ;;  %856 = vmatprep.subr.mxu1 %v498_v44  ;;  %v520_v48 = vsel %vm58_vm0, %v509_v43, -inf }
 0x1b9   :  { %v513_v47 = vrot.slane %v512_v45, 4  ;;  %857 = vmatpush3.msra.mxu1 %v498_v44 }
 0x1ba   :  { %v519_v49 = vsel %vm58_vm0, %v508_v46, -inf }
 0x1bb   :  { %v514_v50 = vmax.f32 %v512_v45, %v513_v47  ;;  %v521_v51 = vmax.f32 %v519_v49, %v520_v48 }
 0x1bd   :  { %v515_v52 = vrot.slane %v514_v50, 2  ;;  %v522_v53 = vrot.slane %v521_v51, 4 }
 0x1bf   :  { %v516_v54 = vmax.f32 %v514_v50, %v515_v52  ;;  %v523_v55 = vmax.f32 %v521_v51, %v522_v53 }
 0x1c1   :  { %v517_v56 = vrot.slane %v516_v54, 1  ;;  %v524_v57 = vrot.slane %v523_v55, 2 }
 0x1c3   :  { %v518_v58 = vmax.f32 %v516_v54, %v517_v56  ;;  %v525_v59 = vmax.f32 %v523_v55, %v524_v57 }
 0x1c5   :  { %v528_v60 = vsub.f32 %v506_v38, %v518_v58  ;;  %v529_v61 = vsub.f32 %v507_v35, %v518_v58  ;;  %v526_v62 = vrot.slane %v525_v59, 1 }
 0x1c7   :  { %v532_v63 = vmul.f32 1.442695, %v528_v60  ;;  %v534_v0 = vmul.f32 1.442695, %v529_v61  ;;  %v527_v1 = vmax.f32 %v525_v59, %v526_v62 }
 0x1c9   :  { %868 = vpow2.f32 %v532_v63  ;;  %v530_v2 = vsub.f32 %v508_v46, %v527_v1  ;;  %v531_v3 = vsub.f32 %v509_v43, %v527_v1 }
 0x1ca   :  { %870 = vpow2.f32 %v534_v0 }
 0x1cb   :  { %v536_v4 = vmul.f32 1.442695, %v530_v2  ;;  %v538_v5 = vmul.f32 1.442695, %v531_v3 }
 0x1cd   :  { %872 = vpow2.f32 %v536_v4 }
 0x1ce   :  { %874 = vpow2.f32 %v538_v5 }
 0x1d6   :  { %v869_v6 = vpop.eup %868 }
 0x1d7   :  { %v871_v7 = vpop.eup %870  ;;  %v540_v8 = vsel %vm58_vm0, %v869_v6, 0.0 }
 0x1d8   :  { %v541_v9 = vsel %vm58_vm0, %v871_v7, 0.0 }
 0x1d9   :  { %v542_v10 = vadd.f32 %v541_v9, %v540_v8 }
 0x1da   :  { %v873_v11 = vpop.eup %872 }
 0x1db   :  { %v875_v12 = vpop.eup %874  ;;  %v543_v13 = vrot.slane %v542_v10, 4  ;;  %v549_v14 = vsel %vm58_vm0, %v873_v11, 0.0 }
 0x1dc   :  { %v550_v15 = vsel %vm58_vm0, %v875_v12, 0.0 }
 0x1dd   :  { %v544_v16 = vadd.f32 %v543_v13, %v542_v10  ;;  %v551_v17 = vadd.f32 %v550_v15, %v549_v14 }
 0x1df   :  { %v545_v18 = vrot.slane %v544_v16, 2  ;;  %v552_v19 = vrot.slane %v551_v17, 4 }
 0x1e1   :  { %v546_v20 = vadd.f32 %v545_v18, %v544_v16  ;;  %v553_v21 = vadd.f32 %v552_v19, %v551_v17 }
 0x1e3   :  { %v547_v22 = vrot.slane %v546_v20, 1  ;;  %v554_v23 = vrot.slane %v553_v21, 2 }
 0x1e5   :  { %v548_v24 = vadd.f32 %v547_v22, %v546_v20  ;;  %v555_v25 = vadd.f32 %v554_v23, %v553_v21 }
 0x1e7   :  { %876 = vrcp.f32 %v548_v24  ;;  %v556_v26 = vrot.slane %v555_v25, 1 }
 0x1e9   :  { %v557_v27 = vadd.f32 %v556_v26, %v555_v25 }
 0x1eb   :  { %878 = vrcp.f32 %v557_v27 }
 0x1f4   :  { %v877_v28 = vpop.eup %876 }
 0x1f5   :  { %v560_v29 = vmul.f32 %v877_v28, %v548_v24 }
 0x1f7   :  { %v562_v30 = vsub.f32 2.0, %v560_v29 }
 0x1f8   :  { %v879_v31 = vpop.eup %878 }
 0x1f9   :  { %v564_v32 = vmul.f32 %v877_v28, %v562_v30  ;;  %v561_v33 = vmul.f32 %v879_v31, %v557_v27 }
 0x1fb   :  { %v566_v34 = vmul.f32 %v869_v6, %v564_v32  ;;  %v567_v35 = vmul.f32 %v871_v7, %v564_v32  ;;  %v563_v36 = vsub.f32 2.0, %v561_v33 }
 0x1fd   :  { %851 = vmatprep.mubr.msk.f32.mxu0 %vm58_vm0, %v566_v34  ;;  %v565_v37 = vmul.f32 %v879_v31, %v563_v36 }
 0x1fe   :  { %852 = vmatmul.mubr.msk.f32.vlgmr.msra.gmra.mxu0 %vm58_vm0, %v567_v35 }
 0x1ff   :  { %v568_v38 = vmul.f32 %v873_v11, %v565_v37  ;;  %v569_v39 = vmul.f32 %v875_v12, %v565_v37 }
 0x201   :  { %858 = vmatprep.mubr.msk.f32.mxu1 %vm58_vm0, %v568_v38 }
 0x202   :  { %859 = vmatmul.mubr.msk.f32.vlgmr.msra.gmra.mxu1 %vm58_vm0, %v569_v39 }
 0x2be   :  { %v853_v40 = vpop.f32.mrf.mxu0 }
 0x2bf   :  { %733 = vst.msk [vmem:[#allocation7 + $0x8] sm:$0xff] %vm58_vm0, %v853_v40 }
 0x2c0   :  { %v642_v41 = vpop.f32.mrf.mxu0 }
 0x2c1   :  { %732 = vst.msk [vmem:[#allocation7] sm:$0xff] %vm58_vm0, %v642_v41 }
 0x2c2   :  { %v860_v42 = vpop.f32.mrf.mxu1 }
 0x2c3   :  { %735 = vst.msk [vmem:[#allocation7 + $0x18] sm:$0xff] %vm58_vm0, %v860_v42 }
 0x2c4   :  { %v723_v43 = vpop.f32.mrf.mxu1 }
 0x2c5   :  { %734 = vst.msk [vmem:[#allocation7 + $0x10] sm:$0xff] %vm58_vm0, %v723_v43 }
 0x2c6   :  { %915 = shalt.err (!%p912_p0)
}
 0x2c7   :  { %s935_s10 = smov 128   ;;  %s936_s11 = smov 8  }
 0x2c8   :  { %747 = dma.vmem_to_hbm [thread:$0]  %s742_s8, 512, %s1028_s4, [#allocation3], %s935_s10, %s935_s10, %s936_s11  }
 0x2c9   :  { %928 = dma.done.wait [#allocation3], 512  }
 0x2ca   :  { %929 = vsyncadd [#allocation3], 4294966784 }
 0x2cb   :  { %751 = vsyncpa [#allocation3], 1 }
 0x2cc   :  { %752 = vsyncpa [#allocation4], 1 }
 0x2cd   :  { %753 = vsyncpa [#allocation6], 1 }

</bundles_post_ra>
